<compile_context>
chip_gen: v6e
topology: v6e:2x2x1
jax: 0.10.0
libtpu: 0.0.40
codegen_flags: <defaults>
</compile_context>

<pallas_src>
import math

import jax
import jax.numpy as jnp
from jax.experimental import pallas as pl
from jax.experimental.pallas import tpu as pltpu


def _pef_store_kernel(s_ref, o_ref):
    """Broadcast-copy one (dim_tile, L) slab into one (batch, dim_tile) block."""
    o_ref[...] = s_ref[...].astype(o_ref.dtype)


def _round_up(x, m):
    return ((x + m - 1) // m) * m


def _smallest_factor(n):
    if n % 2 == 0:
        return 2
    f = 3
    while f * f <= n:
        if n % f == 0:
            return f
        f += 2
    return n


def positional_encoding_fourier(B, T, H, W, weight, bias, *,
                                hidden_dim=32, temperature=10000.0,
                                out_dtype=jnp.float32, dim_tile=None):
    """Pallas implementation of PositionalEncodingFourier.forward(B, T, H, W).

    weight: (dim, 2*hidden_dim, 1, 1, 1)  -- Conv3d 1x1x1 weight
    bias:   (dim,)
    returns: (B, dim, T, H, W) in out_dtype (default float32, matching PyTorch)
    """
    dim = weight.shape[0]
    assert hidden_dim % 2 == 0, "hidden_dim must be even (sin/cos interleave)"
    scale = 2.0 * math.pi
    eps = 1e-6
    L = T * H * W

    # ---- tiny host-side (plain JAX) table / slab construction -------------
    # mask is all-False -> cumsum of ones == index + 1, so the normalized
    # embeddings depend only on t (y) and only on h (x); nothing depends on b,w.
    y_vals = (jnp.arange(1, T + 1, dtype=jnp.float32) / (T + eps)) * scale   # (T,)
    x_vals = (jnp.arange(1, H + 1, dtype=jnp.float32) / (H + eps)) * scale   # (H,)

    k = jnp.arange(hidden_dim, dtype=jnp.float32)
    inv_dim_t = 1.0 / (temperature ** (2.0 * jnp.floor(k / 2.0) / hidden_dim))
    even = (jnp.arange(hidden_dim) % 2) == 0

    def fourier(vals):                        # (n,) -> (n, hd) interleaved sin/cos
        p = vals[:, None] * inv_dim_t[None, :]
        return jnp.where(even[None, :], jnp.sin(p), jnp.cos(p))

    fy = fourier(y_vals)                      # (T, hd)
    fx = fourier(x_vals)                      # (H, hd)

    w = weight.reshape(dim, 2 * hidden_dim).astype(jnp.float32)  # (dim, 2hd)
    wy, wx = w[:, :hidden_dim], w[:, hidden_dim:]
    b_vec = bias.astype(jnp.float32)

    tab_y = jnp.einsum("dk,tk->dt", wy, fy)                      # (dim, T)
    tab_x = jnp.einsum("dk,hk->dh", wx, fx) + b_vec[:, None]     # (dim, H)

    # Per-channel slab, flattened over (T, H, W) -> lane-dense minor axis L.
    slab = tab_y[:, :, None, None] + tab_x[:, None, :, None]     # (dim, T, H, 1)
    slab = jnp.broadcast_to(slab, (dim, T, H, W)).reshape(dim, L)  # (dim, L) f32

    # ---- tile selection ----------------------------------------------------
    L_pad = _round_up(L, 128)
    out_itemsize = jnp.dtype(out_dtype).itemsize

    def _working_set(dt):                     # double-buffered input + output
        out_blk = _round_up(dt, 8) * L_pad * out_itemsize
        in_blk = _round_up(dt, 8) * L_pad * 4
        return 2 * (out_blk + in_blk)

    target = 8 << 20                          # ~8 MiB working set: safe on v7x
    if dim_tile is None:
        dim_tile = dim
        while dim_tile > 1 and _working_set(dim_tile) > target:
            dim_tile //= _smallest_factor(dim_tile)
        # guarantee >= 2 grid steps so v7x megacore gets both TensorCores busy
        if (dim // dim_tile) * B < 2 and dim_tile > 1:
            dim_tile //= _smallest_factor(dim_tile)
    assert dim % dim_tile == 0

    grid = (dim // dim_tile, B)               # B innermost: slab block reused
    vmem_limit = min(max(_working_set(dim_tile) + (4 << 20), 16 << 20), 64 << 20)

    out = pl.pallas_call(
        _pef_store_kernel,
        out_shape=jax.ShapeDtypeStruct((B, dim, L), out_dtype),
        grid_spec=pltpu.PrefetchScalarGridSpec(
            num_scalar_prefetch=0,
            grid=grid,
            in_specs=[
                # index independent of b -> not re-fetched across the inner loop
                pl.BlockSpec((dim_tile, L), lambda d, b: (d, 0)),
            ],
            out_specs=pl.BlockSpec((None, dim_tile, L),
                                   lambda d, b: (b, d, 0)),
        ),
        compiler_params=pltpu.CompilerParams(
            dimension_semantics=("parallel", "parallel"),
            vmem_limit_bytes=vmem_limit),
        cost_estimate=pl.CostEstimate(
            flops=B * dim * L,
            transcendentals=0,
            bytes_accessed=dim * L * 4 + B * dim * L * out_itemsize),
    )(slab)

    # (B, dim, L) -> (B, dim, T, H, W): contiguous reshape, no data movement.
    return out.reshape(B, dim, T, H, W)


def _reference(B, T, H, W, weight, bias, hidden_dim=32, temperature=10000.0):
    """Pure-JAX transcription of the PyTorch forward for validation."""
    scale = 2.0 * math.pi
    eps = 1e-6
    dim = weight.shape[0]
    ones = jnp.ones((B, T, H, W), jnp.float32)
    y_embed = jnp.cumsum(ones, axis=1)
    x_embed = jnp.cumsum(ones, axis=2)
    y_embed = y_embed / (y_embed[:, -1:, :, :] + eps) * scale
    x_embed = x_embed / (x_embed[:, :, -1:, :] + eps) * scale
    k = jnp.arange(hidden_dim, dtype=jnp.float32)
    dim_t = temperature ** (2.0 * jnp.floor(k / 2.0) / hidden_dim)
    pos_x = x_embed[..., None] / dim_t
    pos_y = y_embed[..., None] / dim_t
    pos_x = jnp.stack((jnp.sin(pos_x[..., 0::2]), jnp.cos(pos_x[..., 1::2])),
                      axis=5).reshape(B, T, H, W, hidden_dim)
    pos_y = jnp.stack((jnp.sin(pos_y[..., 0::2]), jnp.cos(pos_y[..., 1::2])),
                      axis=5).reshape(B, T, H, W, hidden_dim)
    pos = jnp.concatenate((pos_y, pos_x), axis=4)  # (B,T,H,W,2*hd)
    w = weight.reshape(dim, 2 * hidden_dim)
    out = jnp.einsum("bthwc,dc->bthwd", pos, w) + bias
    return jnp.transpose(out, (0, 4, 1, 2, 3))


if __name__ == "__main__":
    # small, forward-consistent shapes; L = T*H*W = 512 -> lane-dense stores
    B, T, H, W = 2, 4, 8, 16
    hidden_dim = 32
    dim = 128
    temperature = 10000.0

    key = jax.random.PRNGKey(0)
    kw, kb = jax.random.split(key)
    # Conv3d(2*hidden_dim, dim, kernel_size=1) parameters, deterministic init.
    weight = jax.random.normal(kw, (dim, 2 * hidden_dim, 1, 1, 1),
                               dtype=jnp.float32) * 0.02
    bias = jax.random.normal(kb, (dim,), dtype=jnp.float32) * 0.02

    ref = _reference(B, T, H, W, weight, bias,
                     hidden_dim=hidden_dim, temperature=temperature)

    # f32 output (matches the PyTorch module exactly)
    out = positional_encoding_fourier(B, T, H, W, weight, bias,
                                      hidden_dim=hidden_dim,
                                      temperature=temperature)
    out = jax.block_until_ready(out)
    assert out.shape == (B, dim, T, H, W)
    assert jnp.allclose(out, ref, atol=1e-4, rtol=1e-4)

    # bf16 output path (halves HBM store bytes on this store-bound kernel)
    out_bf16 = positional_encoding_fourier(B, T, H, W, weight, bias,
                                           hidden_dim=hidden_dim,
                                           temperature=temperature,
                                           out_dtype=jnp.bfloat16)
    out_bf16 = jax.block_until_ready(out_bf16)
    assert out_bf16.shape == (B, dim, T, H, W)
    assert jnp.allclose(out_bf16.astype(jnp.float32), ref, atol=2e-2, rtol=2e-2)

    print("KERNEL_OK")
</pallas_src>

<mosaic_0001>
module attributes {stable_mosaic.version = 11 : i64} {
  func.func @_pef_store_kernel(%arg0: i32, %arg1: i32, %arg2: memref<128x512xf32, #tpu.memory_space<vmem>>, %arg3: memref<1x128x512xf32, #tpu.memory_space<vmem>>) attributes {dimension_semantics = [#tpu.dimension_semantics<parallel>, #tpu.dimension_semantics<parallel>], iteration_bounds = array<i64: 1, 2>, scalar_prefetch = 0 : i64, scratch_operands = 0 : i64, tpu.core_type = #tpu.core_type<tc>, window_params = [{transform_indices = @transform_0, window_bounds = array<i64: 128, 512>}, {transform_indices = @transform_1, window_bounds = array<i64: 1, 128, 512>}]} {
    %c0 = arith.constant 0 : index
    %c0_0 = arith.constant 0 : index
    %0 = vector.load %arg2[%c0, %c0_0] : memref<128x512xf32, #tpu.memory_space<vmem>>, vector<128x512xf32>
    %c0_1 = arith.constant 0 : index
    %c0_2 = arith.constant 0 : index
    %c0_3 = arith.constant 0 : index
    %1 = vector.load %arg3[%c0_1, %c0_2, %c0_3] : memref<1x128x512xf32, #tpu.memory_space<vmem>>, vector<1x128x512xf32>
    %2 = vector.shape_cast %1 : vector<1x128x512xf32> to vector<128x512xf32>
    %3 = vector.shape_cast %0 : vector<128x512xf32> to vector<1x128x512xf32>
    tpu.vector_store %arg3[%c0_1, %c0_2, %c0_3], %3 {strides = array<i32>} : memref<1x128x512xf32, #tpu.memory_space<vmem>>, vector<1x128x512xf32>,
    return
  }
  func.func @transform_0(%arg0: i32, %arg1: i32) -> (i32, i32) {
    %c0_i32 = arith.constant 0 : i32
    %c0_i32_0 = arith.constant 0 : i32
    return %arg0, %c0_i32 : i32, i32
  }
  func.func @transform_1(%arg0: i32, %arg1: i32) -> (i32, i32, i32) {
    %c0_i32 = arith.constant 0 : i32
    %c0_i32_0 = arith.constant 0 : i32
    return %arg1, %arg0, %c0_i32 : i32, i32, i32
  }
}

</mosaic_0001>

<bundles_post_ra>
// kernel: tpu_custom_call.1
= control target key start
LH: loop header
LB: loop body
LE: loop exit
PB: predicated region body
PF: predicated region fallthrough
CT: control target
= control target key end

     0   :  { %6 = vsyncpa [#allocation3], 0  ;;  %s763_s0 = inlined_call_operand.hbm [shape: f32[128,512], index: 0, kind: input, shape index: {}]   ;;  %s764_s1 = inlined_call_operand.hbm [shape: f32[2,128,512], index: 1, kind: output, shape index: {}]  }
   0x1   :  { %7 = vsyncpa [#allocation4], 0 }
   0x2   :  { %9 = vsyncpa [#allocation4 + $0x1], 0  ;;  %s562_s6 = smov 0   ;;  %s564_s7 = smov 0  }
   0x3   :  { %s566_s8 = smov 0   ;;  %s568_s9 = smov 0  }
   0x4   :  { %s570_s10 = smov 0   ;;  %s572_s11 = smov 0  }
   0x5 LB: > { %s355_s12 = sadd.s32 4294967295, %s544_s11   ;;  %s356_s13 = sadd.s32 4294967294, %s544_s11   ;;  %s544_s11 = sphi %s572_s11, %s15_s11   ;;  %s540_s10 = sphi %s570_s10, %s773_s10   ;;  %s536_s9 = sphi %s568_s9, %s772_s9   ;;  %s532_s8 = sphi %s566_s8, %s771_s8   ;;  %s528_s7 = sphi %s564_s7, %s770_s7   ;;  %s524_s6 = sphi %s562_s6, %s769_s6  }
   0x6   : > { %s24_s14 = sadd.s32 1, %s540_s10  ;;  %s62_s15 = sadd.s32 1, %s532_s8 }
   0x7   : > { %p25_p0 = scmp.ge.s32.totalorder %s24_s14, 2  ;;  %p72_p1 = scmp.ne.s32.totalorder %s532_s8, %s528_s7 }
   0x8   : > { %p73_p2 = scmp.eq.s32.totalorder %s355_s12, 1  ;;  %p78_p3 = scmp.ne.s32.totalorder %s528_s7, %s524_s6 }
   0x9   : > { %s775_s14 = smov (%p25_p0, %s24_s14), 0  ;;  %p79_p5 = scmp.eq.s32.totalorder %s356_s13, 1 }
   0xa   : > { %p602_p4 = por %p73_p2, %p72_p1  ;;  %s57_s17 = ssub.s32 %s540_s10, %s775_s14 }
   0xb   : > { %p357_p6 = scmp.ge.s32.totalorder %s544_s11, 1  ;;  %p60_p7 = scmp.eq.s32.totalorder %s57_s17, 0 }
   0xc   : > { %p609_p8 = por %p79_p5, %p78_p3  ;;  %p86_p9 = scmp.lt.s32.totalorder %s544_s11, 3 }
   0xd   : > { %s615_s19 = scalar_select %p60_p7, %s532_s8, %s62_s15  }
   0xe   : > { %p617_p10 = pnand %p357_p6, %p86_p9  ;;  %p621_p11 = scmp.eq.s32.totalorder %s355_s12, 0 }
   0xf   : > { %s546_s22 = smov [#allocation2]  }
  0x10   : > { %p374_p12 = pneg %p617_p10  ;;  %s102_s23 = sshll.u32 %s546_s22, 4  ;;  %s103_s23 = int_to_ptr.vmem [resolvable:$true] %s102_s23 }
  0x11   : > { %s449_s24 = scalar_lea.vmem %s103_s23, 8192  ;;  %p457_p5 = scmp.lt.s32.totalorder %s103_s23, %s103_s23 }
  0x12   : > { %p375_p13 = pnand %p621_p11, %p374_p12  ;;  %p450_p1 = scmp.ne.s32.totalorder %s103_s23, %s449_s24 }
  0x13   : > { %p458_p6 = scmp.lt.s32.totalorder %s449_s24, %s449_s24 }
  0x14   : > { %p440_p0 = pneg %p375_p13 }
  0x15   : > { %p459_p7 = por %p458_p6, %p457_p5 }
  0x16   : > { %p452_p2 = pnand %p450_p1, %p440_p0 }
  0x18   : > { %p453_p3 = pneg %p452_p2 }
  0x1a   : > { %p460_p9 = pnand %p459_p7, %p453_p3 }
  0x1c   : > { %463 = shalt.err (!%p460_p9)
}
  0x1d   : > { %s547_s25 = smov 512   ;;  %s548_s26 = smov 32  }
  0x1e   : > { %377 = dma.hbm_to_vmem [thread:$0]  (!%p375_p13), %s763_s0, 8192, %s103_s23, [#allocation3], %s547_s25, %s547_s25, %s548_s26  }
  0x1f   : > { %118 = sbr.rel (%p617_p10) target bundleno = 85 (0x55), region = 24 }
  0x24   : > { %515 = dma.done.wait (%p621_p11), [#allocation3], 8192  }
  0x25   : > { %517 = vsyncadd (%p621_p11), [#allocation3], 4294959104  ;;  %s130_s29 = sand.u32 1, %s528_s7   ;;  %v135_v0 = vld [vmem:[#allocation2] sm:$0xff]  ;;  %v136_v1 = vld [vmem:[#allocation2 + $0x8] sm:$0xff]  ;;  %s367_s3 = sshll.u32 %s536_s9, 13 }
  0x26   : > { %s361_s30 = sshll.u32 %s130_s29, 9  ;;  %v137_v2 = vld [vmem:[#allocation2 + $0x10] sm:$0xff]  ;;  %v138_v3 = vld [vmem:[#allocation2 + $0x18] sm:$0xff]  ;;  %v139_v4 = vld [vmem:[#allocation2 + $0x20] sm:$0xff]  ;;  %s705_s12 = scalar_lea.hbm %s764_s1, %s367_s3 }
  0x27   : > { %s641_s2 = scalar_lea.vmem [#allocation5], %s361_s30  ;;  %v140_v5 = vld [vmem:[#allocation2 + $0x28] sm:$0xff]  ;;  %v141_v6 = vld [vmem:[#allocation2 + $0x30] sm:$0xff]  ;;  %v142_v7 = vld [vmem:[#allocation2 + $0x38] sm:$0xff]  ;;  %s718_s13 = scalar_lea.sflag [#allocation4], %s130_s29 }
  0x28   : > { %199 = vst [vmem:[%s641_s2] sm:$0xff] %v135_v0  ;;  %200 = vst [vmem:[%s641_s2 + $0x8] sm:$0xff] %v136_v1  ;;  %v143_v8 = vld [vmem:[#allocation2 + $0x40] sm:$0xff]  ;;  %v144_v9 = vld [vmem:[#allocation2 + $0x48] sm:$0xff]  ;;  %s280_s4 = sshll.u32 %s641_s2, 4  ;;  %s549_s17 = smov [#allocation5]   ;;  %s710_s4 = int_to_ptr.vmem [resolvable:$true] %s280_s4 }
  0x29   : > { %201 = vst [vmem:[%s641_s2 + $0x10] sm:$0xff] %v137_v2  ;;  %202 = vst [vmem:[%s641_s2 + $0x18] sm:$0xff] %v138_v3  ;;  %v145_v10 = vld [vmem:[#allocation2 + $0x50] sm:$0xff]  ;;  %v146_v11 = vld [vmem:[#allocation2 + $0x58] sm:$0xff]  ;;  %s464_s15 = scalar_lea.vmem %s710_s4, 8192  ;;  %s468_s20 = sshll.u32 %s549_s17, 4  ;;  %s469_s20 = int_to_ptr.vmem [resolvable:$false] %s468_s20 }
  0x2a   : > { %203 = vst [vmem:[%s641_s2 + $0x20] sm:$0xff] %v139_v4  ;;  %204 = vst [vmem:[%s641_s2 + $0x28] sm:$0xff] %v140_v5  ;;  %v147_v12 = vld [vmem:[#allocation2 + $0x60] sm:$0xff]  ;;  %v148_v13 = vld [vmem:[#allocation2 + $0x68] sm:$0xff]  ;;  %p465_p10 = scmp.ne.s32.totalorder %s710_s4, %s464_s15  ;;  %s470_s21 = scalar_lea.vmem %s469_s20, 16384 }
  0x2b   : > { %205 = vst [vmem:[%s641_s2 + $0x30] sm:$0xff] %v141_v6  ;;  %206 = vst [vmem:[%s641_s2 + $0x38] sm:$0xff] %v142_v7  ;;  %v149_v14 = vld [vmem:[#allocation2 + $0x70] sm:$0xff]  ;;  %v150_v15 = vld [vmem:[#allocation2 + $0x78] sm:$0xff]  ;;  %p471_p13 = scmp.lt.s32.totalorder %s710_s4, %s469_s20  ;;  %p472_p0 = scmp.lt.s32.totalorder %s470_s21, %s464_s15 }
  0x2c   : > { %207 = vst [vmem:[%s641_s2 + $0x40] sm:$0xff] %v143_v8  ;;  %208 = vst [vmem:[%s641_s2 + $0x48] sm:$0xff] %v144_v9  ;;  %v151_v16 = vld [vmem:[#allocation2 + $0x80] sm:$0xff]  ;;  %v152_v17 = vld [vmem:[#allocation2 + $0x88] sm:$0xff]  ;;  %p466_p11 = pnand %p465_p10, %p602_p4 }
  0x2d   : > { %209 = vst [vmem:[%s641_s2 + $0x50] sm:$0xff] %v145_v10  ;;  %210 = vst [vmem:[%s641_s2 + $0x58] sm:$0xff] %v146_v11  ;;  %v153_v18 = vld [vmem:[#allocation2 + $0x90] sm:$0xff]  ;;  %v154_v19 = vld [vmem:[#allocation2 + $0x98] sm:$0xff]  ;;  %p473_p1 = por %p472_p0, %p471_p13 }
  0x2e   : > { %211 = vst [vmem:[%s641_s2 + $0x60] sm:$0xff] %v147_v12  ;;  %212 = vst [vmem:[%s641_s2 + $0x68] sm:$0xff] %v148_v13  ;;  %v155_v20 = vld [vmem:[#allocation2 + $0xa0] sm:$0xff]  ;;  %v156_v21 = vld [vmem:[#allocation2 + $0xa8] sm:$0xff]  ;;  %p467_p12 = pneg %p466_p11 }
  0x2f   : > { %213 = vst [vmem:[%s641_s2 + $0x70] sm:$0xff] %v149_v14  ;;  %214 = vst [vmem:[%s641_s2 + $0x78] sm:$0xff] %v150_v15  ;;  %v157_v22 = vld [vmem:[#allocation2 + $0xb0] sm:$0xff]  ;;  %v158_v23 = vld [vmem:[#allocation2 + $0xb8] sm:$0xff] }
  0x30   : > { %215 = vst [vmem:[%s641_s2 + $0x80] sm:$0xff] %v151_v16  ;;  %216 = vst [vmem:[%s641_s2 + $0x88] sm:$0xff] %v152_v17  ;;  %v159_v24 = vld [vmem:[#allocation2 + $0xc0] sm:$0xff]  ;;  %v160_v25 = vld [vmem:[#allocation2 + $0xc8] sm:$0xff]  ;;  %p474_p2 = pnand %p473_p1, %p467_p12 }
  0x31   : > { %217 = vst [vmem:[%s641_s2 + $0x90] sm:$0xff] %v153_v18  ;;  %218 = vst [vmem:[%s641_s2 + $0x98] sm:$0xff] %v154_v19  ;;  %v161_v26 = vld [vmem:[#allocation2 + $0xd0] sm:$0xff]  ;;  %v162_v27 = vld [vmem:[#allocation2 + $0xd8] sm:$0xff] }
  0x32   : > { %219 = vst [vmem:[%s641_s2 + $0xa0] sm:$0xff] %v155_v20  ;;  %220 = vst [vmem:[%s641_s2 + $0xa8] sm:$0xff] %v156_v21  ;;  %v163_v28 = vld [vmem:[#allocation2 + $0xe0] sm:$0xff]  ;;  %v164_v29 = vld [vmem:[#allocation2 + $0xe8] sm:$0xff] }
  0x33   : > { %221 = vst [vmem:[%s641_s2 + $0xb0] sm:$0xff] %v157_v22  ;;  %222 = vst [vmem:[%s641_s2 + $0xb8] sm:$0xff] %v158_v23  ;;  %v165_v30 = vld [vmem:[#allocation2 + $0xf0] sm:$0xff]  ;;  %v166_v31 = vld [vmem:[#allocation2 + $0xf8] sm:$0xff] }
  0x34   : > { %223 = vst [vmem:[%s641_s2 + $0xc0] sm:$0xff] %v159_v24  ;;  %224 = vst [vmem:[%s641_s2 + $0xc8] sm:$0xff] %v160_v25  ;;  %v167_v32 = vld [vmem:[#allocation2 + $0x100] sm:$0xff]  ;;  %v168_v33 = vld [vmem:[#allocation2 + $0x108] sm:$0xff] }
  0x35   : > { %225 = vst [vmem:[%s641_s2 + $0xd0] sm:$0xff] %v161_v26  ;;  %226 = vst [vmem:[%s641_s2 + $0xd8] sm:$0xff] %v162_v27  ;;  %v169_v34 = vld [vmem:[#allocation2 + $0x110] sm:$0xff]  ;;  %v170_v35 = vld [vmem:[#allocation2 + $0x118] sm:$0xff] }
  0x36   : > { %227 = vst [vmem:[%s641_s2 + $0xe0] sm:$0xff] %v163_v28  ;;  %228 = vst [vmem:[%s641_s2 + $0xe8] sm:$0xff] %v164_v29  ;;  %v171_v36 = vld [vmem:[#allocation2 + $0x120] sm:$0xff]  ;;  %v172_v37 = vld [vmem:[#allocation2 + $0x128] sm:$0xff] }
  0x37   : > { %229 = vst [vmem:[%s641_s2 + $0xf0] sm:$0xff] %v165_v30  ;;  %230 = vst [vmem:[%s641_s2 + $0xf8] sm:$0xff] %v166_v31  ;;  %v173_v38 = vld [vmem:[#allocation2 + $0x130] sm:$0xff]  ;;  %v174_v39 = vld [vmem:[#allocation2 + $0x138] sm:$0xff] }
  0x38   : > { %231 = vst [vmem:[%s641_s2 + $0x100] sm:$0xff] %v167_v32  ;;  %232 = vst [vmem:[%s641_s2 + $0x108] sm:$0xff] %v168_v33  ;;  %v175_v40 = vld [vmem:[#allocation2 + $0x140] sm:$0xff]  ;;  %v176_v41 = vld [vmem:[#allocation2 + $0x148] sm:$0xff] }
  0x39   : > { %233 = vst [vmem:[%s641_s2 + $0x110] sm:$0xff] %v169_v34  ;;  %234 = vst [vmem:[%s641_s2 + $0x118] sm:$0xff] %v170_v35  ;;  %v177_v42 = vld [vmem:[#allocation2 + $0x150] sm:$0xff]  ;;  %v178_v43 = vld [vmem:[#allocation2 + $0x158] sm:$0xff] }
  0x3a   : > { %235 = vst [vmem:[%s641_s2 + $0x120] sm:$0xff] %v171_v36  ;;  %236 = vst [vmem:[%s641_s2 + $0x128] sm:$0xff] %v172_v37  ;;  %v179_v44 = vld [vmem:[#allocation2 + $0x160] sm:$0xff]  ;;  %v180_v45 = vld [vmem:[#allocation2 + $0x168] sm:$0xff] }
  0x3b   : > { %237 = vst [vmem:[%s641_s2 + $0x130] sm:$0xff] %v173_v38  ;;  %238 = vst [vmem:[%s641_s2 + $0x138] sm:$0xff] %v174_v39  ;;  %v181_v46 = vld [vmem:[#allocation2 + $0x170] sm:$0xff]  ;;  %v182_v47 = vld [vmem:[#allocation2 + $0x178] sm:$0xff] }
  0x3c   : > { %239 = vst [vmem:[%s641_s2 + $0x140] sm:$0xff] %v175_v40  ;;  %240 = vst [vmem:[%s641_s2 + $0x148] sm:$0xff] %v176_v41  ;;  %v183_v48 = vld [vmem:[#allocation2 + $0x180] sm:$0xff]  ;;  %v184_v49 = vld [vmem:[#allocation2 + $0x188] sm:$0xff] }
  0x3d   : > { %241 = vst [vmem:[%s641_s2 + $0x150] sm:$0xff] %v177_v42  ;;  %242 = vst [vmem:[%s641_s2 + $0x158] sm:$0xff] %v178_v43  ;;  %v185_v50 = vld [vmem:[#allocation2 + $0x190] sm:$0xff]  ;;  %v186_v51 = vld [vmem:[#allocation2 + $0x198] sm:$0xff] }
  0x3e   : > { %243 = vst [vmem:[%s641_s2 + $0x160] sm:$0xff] %v179_v44  ;;  %244 = vst [vmem:[%s641_s2 + $0x168] sm:$0xff] %v180_v45  ;;  %v187_v52 = vld [vmem:[#allocation2 + $0x1a0] sm:$0xff]  ;;  %v188_v53 = vld [vmem:[#allocation2 + $0x1a8] sm:$0xff] }
  0x3f   : > { %245 = vst [vmem:[%s641_s2 + $0x170] sm:$0xff] %v181_v46  ;;  %246 = vst [vmem:[%s641_s2 + $0x178] sm:$0xff] %v182_v47  ;;  %v189_v54 = vld [vmem:[#allocation2 + $0x1b0] sm:$0xff]  ;;  %v190_v55 = vld [vmem:[#allocation2 + $0x1b8] sm:$0xff] }
  0x40   : > { %247 = vst [vmem:[%s641_s2 + $0x180] sm:$0xff] %v183_v48  ;;  %248 = vst [vmem:[%s641_s2 + $0x188] sm:$0xff] %v184_v49  ;;  %v191_v56 = vld [vmem:[#allocation2 + $0x1c0] sm:$0xff]  ;;  %v192_v57 = vld [vmem:[#allocation2 + $0x1c8] sm:$0xff] }
  0x41   : > { %249 = vst [vmem:[%s641_s2 + $0x190] sm:$0xff] %v185_v50  ;;  %250 = vst [vmem:[%s641_s2 + $0x198] sm:$0xff] %v186_v51  ;;  %v193_v58 = vld [vmem:[#allocation2 + $0x1d0] sm:$0xff]  ;;  %v194_v59 = vld [vmem:[#allocation2 + $0x1d8] sm:$0xff] }
  0x42   : > { %251 = vst [vmem:[%s641_s2 + $0x1a0] sm:$0xff] %v187_v52  ;;  %252 = vst [vmem:[%s641_s2 + $0x1a8] sm:$0xff] %v188_v53  ;;  %v195_v60 = vld [vmem:[#allocation2 + $0x1e0] sm:$0xff]  ;;  %v196_v61 = vld [vmem:[#allocation2 + $0x1e8] sm:$0xff] }
  0x43   : > { %253 = vst [vmem:[%s641_s2 + $0x1b0] sm:$0xff] %v189_v54  ;;  %254 = vst [vmem:[%s641_s2 + $0x1b8] sm:$0xff] %v190_v55  ;;  %v197_v62 = vld [vmem:[#allocation2 + $0x1f0] sm:$0xff]  ;;  %v198_v63 = vld [vmem:[#allocation2 + $0x1f8] sm:$0xff] }
  0x44   : > { %255 = vst [vmem:[%s641_s2 + $0x1c0] sm:$0xff] %v191_v56  ;;  %256 = vst [vmem:[%s641_s2 + $0x1c8] sm:$0xff] %v192_v57 }
  0x45   : > { %257 = vst [vmem:[%s641_s2 + $0x1d0] sm:$0xff] %v193_v58  ;;  %258 = vst [vmem:[%s641_s2 + $0x1d8] sm:$0xff] %v194_v59 }
  0x46   : > { %259 = vst [vmem:[%s641_s2 + $0x1e0] sm:$0xff] %v195_v60  ;;  %260 = vst [vmem:[%s641_s2 + $0x1e8] sm:$0xff] %v196_v61 }
  0x47   : > { %261 = vst [vmem:[%s641_s2 + $0x1f0] sm:$0xff] %v197_v62  ;;  %262 = vst [vmem:[%s641_s2 + $0x1f8] sm:$0xff] %v198_v63 }
  0x48   : > { %477 = shalt.err (!%p474_p2)
}
  0x49   : > { %s478_s22 = scalar_lea.hbm %s705_s12, 8192  ;;  %s482_s25 = scalar_lea.hbm %s764_s1, 16384 }
  0x4a   : > { %p479_p3 = scmp.ne.s32.totalorder %s705_s12, %s478_s22  ;;  %p483_p7 = scmp.lt.s32.totalorder %s705_s12, %s764_s1 }
  0x4b   : > { %p484_p9 = scmp.lt.s32.totalorder %s482_s25, %s478_s22 }
  0x4c   : > { %p480_p5 = pnand %p479_p3, %p602_p4 }
  0x4d   : > { %p485_p10 = por %p484_p9, %p483_p7 }
  0x4e   : > { %p481_p6 = pneg %p480_p5 }
  0x50   : > { %p486_p11 = pnand %p485_p10, %p481_p6 }
  0x52   : > { %489 = shalt.err (!%p486_p11)
}
  0x53   : > { %s550_s28 = smov 512   ;;  %s551_s29 = smov 32  }
  0x54   : > { %372 = dma.vmem_to_hbm [thread:$0]  (%p602_p4), %s710_s4, 8192, %s705_s12, %s718_s13, %s550_s28, %s550_s28, %s551_s29  }
  0x55 PF: > { %p384_p12 = scmp.ge.s32.totalorder %s544_s11, 2  ;;  %s295_s30 = sand.u32 1, %s524_s6  }
  0x56   : > { %s296_s2 = scalar_lea.sflag [#allocation4], %s295_s30 }
  0x57   : > { %p379_p13 = pnand %p384_p12, %p609_p8 }
  0x59   : > { %p380_p0 = pneg %p379_p13 }
  0x5b   : > { %519 = dma.done.wait (%p380_p0), %s296_s2, 8192  }
  0x5c   : > { %521 = vsyncadd (%p380_p0), %s296_s2, 4294959104  ;;  %s15_s11 = sadd.s32 1, %s544_s11   ;;  %s769_s6 = smov %s528_s7 }
  0x5d   : > { %p12_p1 = scmp.ge.s32.totalorder %s15_s11, 4   ;;  %s770_s7 = smov %s532_s8 }
  0x5e   : > { %s771_s8 = smov %s615_s19  ;;  %s772_s9 = smov %s540_s10 }
  0x5f   : > { %s773_s10 = smov %s775_s14  ;;  %14 = sbr.rel (!%p12_p1) target bundleno = 5 (0x5), region = 62 }
  0x64   :  { %301 = vsyncpa [#allocation3], 1 }
  0x65   :  { %303 = vsyncpa [#allocation3 + $0x1], 1 }
  0x66   :  { %304 = vsyncpa [#allocation4], 1 }
  0x67   :  { %306 = vsyncpa [#allocation4 + $0x1], 1 }

</bundles_post_ra>
